<compile_context>
chip_gen: v5e
topology: v5e:2x2
jax: 0.10.0
libtpu: 0.0.40
codegen_flags: <defaults>
</compile_context>

<pallas_src>
import math

import jax
import jax.numpy as jnp
from jax.experimental import pallas as pl
from jax.experimental.pallas import tpu as pltpu

_D = 128          # lane width
_CHUNK = 256      # rows per inner VPU step (~32 f32 vregs live per operand)
_NUM_CORES = 2    # leading "parallel" grid axis (megacore split on v7x)


def _round_up(x, m):
    return ((x + m - 1) // m) * m


def _make_sq_kernel(tile_rows, chunk_rows, n_rows, tiles_per_core,
                    first_mask_tile, needs_mask):
    """Streaming sum-of-squared-errors kernel.

    x_ref  : VMEM (tile_rows, 128) native dtype -- target row-tile
    xp_ref : VMEM (tile_rows, 128) native dtype -- prediction row-tile
    acc_ref: VMEM (8, 128) f32                  -- per-core sublane accumulator
    """
    n_chunks = tile_rows // chunk_rows

    def kernel(x_ref, xp_ref, acc_ref):
        c = pl.program_id(0)          # core axis ("parallel")
        t = pl.program_id(1)          # tile within this core ("arbitrary")
        gtile = c * tiles_per_core + t

        @pl.when(t == 0)
        def _init():
            acc_ref[...] = jnp.zeros_like(acc_ref)

        def accumulate(masked):
            # Chunked accumulation bounds the vreg live range; the accumulator
            # stays sublane-shaped so the hot loop is pure VPU adds (the final
            # 8->1 sublane + lane reduce happens once in the wrapper).
            def body(k, carry):
                off = pl.multiple_of(k * chunk_rows, chunk_rows)
                d = (x_ref[pl.ds(off, chunk_rows), :].astype(jnp.float32)
                     - xp_ref[pl.ds(off, chunk_rows), :].astype(jnp.float32))
                if masked:
                    row = (gtile * tile_rows + off
                           + jax.lax.broadcasted_iota(
                               jnp.int32, (chunk_rows, 1), 0))
                    # Mask BEFORE squaring so padded rows contribute exactly 0.
                    d = jnp.where(row < n_rows, d, 0.0)
                acc_ref[...] += jnp.sum(
                    (d * d).reshape(chunk_rows // 8, 8, _D), axis=0)
                return carry

            jax.lax.fori_loop(0, n_chunks, body, 0, unroll=(n_chunks <= 4))

        if needs_mask:
            # Only the partial tile and clamped overflow tiles pay the mask.
            @pl.when(gtile < first_mask_tile)
            def _full():
                accumulate(masked=False)

            @pl.when(gtile >= first_mask_tile)
            def _tail():
                accumulate(masked=True)
        else:
            accumulate(masked=False)

    return kernel


def neural_trainer_metrics(target, x_pred, log_noise, *, tile_rows=4096):
    """(log_likelihood, rmse, psnr) matching NeuralTrainer._compute_log_likelihood
    (summed Gaussian log density, affine in SSE) and _evaluate_performance."""

    # Glue: flatten to (n_rows, 128) with 128 on the lane axis; stream native
    # dtypes and upcast to f32 inside the kernel.
    total = 1
    for s in target.shape:
        total *= s
    assert total % _D == 0, "example sizes chosen so total elems % 128 == 0"
    n_rows = total // _D
    x2d = target.reshape(n_rows, _D)
    xp2d = x_pred.reshape(n_rows, _D)

    # chunk_eff | tile_eff, both multiples of 8; tile_eff never larger than
    # needed to cover the (8-rounded, chunk-rounded) row count.
    chunk_eff = min(_CHUNK, _round_up(min(tile_rows, n_rows), 8))
    tile_eff = min(_round_up(tile_rows, chunk_eff),
                   _round_up(n_rows, chunk_eff))

    total_tiles = pl.cdiv(n_rows, tile_eff)
    tiles_per_core = pl.cdiv(total_tiles, _NUM_CORES)
    full_tiles = n_rows // tile_eff                       # fully in-bounds tiles
    needs_mask = (_NUM_CORES * tiles_per_core) > full_tiles
    grid = (_NUM_CORES, tiles_per_core)

    def in_map(c, t):
        g = c * tiles_per_core + t
        # Clamp overflow tiles (uneven split across cores) back onto the last
        # real tile; their rows are fully masked in-kernel anyway.
        return (jnp.minimum(g, total_tiles - 1), 0)

    it_x = jnp.dtype(target.dtype).itemsize
    it_xp = jnp.dtype(x_pred.dtype).itemsize
    cost = pl.CostEstimate(
        flops=3 * n_rows * _D,
        transcendentals=0,
        bytes_accessed=n_rows * _D * (it_x + it_xp) + _NUM_CORES * 8 * _D * 4,
    )
    # 2 inputs x 2 pipeline buffers x one block each, plus headroom; capped so
    # it stays valid on v7x's 64 MiB physical VMEM.
    vmem_limit = int(min(
        64 * 1024 * 1024,
        max(16 * 1024 * 1024,
            2 * tile_eff * _D * (it_x + it_xp) + (2 << 20)),
    ))

    acc = pl.pallas_call(
        _make_sq_kernel(tile_eff, chunk_eff, n_rows, tiles_per_core,
                        full_tiles, needs_mask),
        out_shape=jax.ShapeDtypeStruct((_NUM_CORES, 8, _D), jnp.float32),
        grid=grid,
        in_specs=[
            pl.BlockSpec((tile_eff, _D), in_map),   # target tile
            pl.BlockSpec((tile_eff, _D), in_map),   # prediction tile
        ],
        out_specs=pl.BlockSpec((None, 8, _D), lambda c, t: (c, 0, 0)),
        compiler_params=pltpu.CompilerParams(
            dimension_semantics=("parallel", "arbitrary"),
            vmem_limit_bytes=vmem_limit,
        ),
        cost_estimate=cost,
    )(x2d, xp2d)

    # Final reduction (2 cores x 8 sublanes x 128 lanes -> scalar), done once.
    sse = jnp.sum(acc)

    # Gaussian log density summed over the squeezed tensor is affine in SSE:
    #   sum logN(x; x_pred, var) = N*(-0.5*log(2*pi*var)) - SSE/(2*var)
    var = jnp.exp(log_noise).astype(jnp.float32) ** 2
    log_norm = -0.5 * jnp.log(2.0 * jnp.pi * var)
    n_elems = n_rows * _D
    log_likelihood = n_elems * log_norm - sse / (2.0 * var)

    mse = sse / n_elems
    rmse = jnp.sqrt(mse)
    psnr = 10.0 * (jnp.log(1.0 / mse) / jnp.log(10.0))
    return log_likelihood, rmse, psnr


def _reference(target, x_pred, log_noise):
    xf = target.reshape(-1).astype(jnp.float32)
    xpf = x_pred.reshape(-1).astype(jnp.float32)
    var = jnp.exp(jnp.float32(log_noise)) ** 2
    ll = jnp.sum(-0.5 * jnp.log(2.0 * jnp.pi * var)
                 - (xf - xpf) ** 2 / (2.0 * var))
    mse = jnp.mean((xf - xpf) ** 2)
    return ll, jnp.sqrt(mse), 10.0 * jnp.log10(1.0 / mse)


if __name__ == "__main__":
    key = jax.random.PRNGKey(0)
    log_noise = jnp.float32(-1.0)   # self.log_noise (observation noise param)

    # Case 1: small NCHW image-regression shapes (single tile, overflow tile
    # on the second core fully masked).
    k1, k2, k3, k4 = jax.random.split(key, 4)
    B, C, H, W = 2, 4, 16, 16
    target1 = jax.random.normal(k1, (B, C, H, W), dtype=jnp.float32)
    pred1 = target1 + 0.1 * jax.random.normal(k2, (B, C, H, W), dtype=jnp.float32)

    ll1, rmse1, psnr1 = jax.block_until_ready(
        neural_trainer_metrics(target1, pred1, log_noise))
    ll1_r, rmse1_r, psnr1_r = _reference(target1, pred1, log_noise)
    assert jnp.allclose(ll1, ll1_r, rtol=1e-4, atol=1e-3), "case1 ll mismatch"
    assert jnp.allclose(rmse1, rmse1_r, rtol=1e-4, atol=1e-6), "case1 rmse mismatch"
    assert jnp.allclose(psnr1, psnr1_r, rtol=1e-4, atol=1e-3), "case1 psnr mismatch"

    # Case 2: mixed dtypes + multi-chunk + both cores doing real work + a
    # partial (masked) tail tile, via a small tile_rows override.
    target2 = jax.random.normal(k3, (2, 4, 96, 96), dtype=jnp.float32)
    pred2 = (target2
             + 0.1 * jax.random.normal(k4, (2, 4, 96, 96), dtype=jnp.float32)
             ).astype(jnp.bfloat16)

    ll2, rmse2, psnr2 = jax.block_until_ready(
        neural_trainer_metrics(target2, pred2, log_noise, tile_rows=512))
    ll2_r, rmse2_r, psnr2_r = _reference(target2, pred2, log_noise)
    assert jnp.allclose(ll2, ll2_r, rtol=2e-4, atol=1e-2), "case2 ll mismatch"
    assert jnp.allclose(rmse2, rmse2_r, rtol=2e-4, atol=1e-6), "case2 rmse mismatch"
    assert jnp.allclose(psnr2, psnr2_r, rtol=2e-4, atol=1e-3), "case2 psnr mismatch"

    print("KERNEL_OK")
</pallas_src>

<mosaic_0001>
module attributes {stable_mosaic.version = 11 : i64} {
  func.func @kernel(%arg0: i32, %arg1: i32, %arg2: memref<16x128xf32, #tpu.memory_space<vmem>>, %arg3: memref<16x128xf32, #tpu.memory_space<vmem>>, %arg4: memref<1x8x128xf32, #tpu.memory_space<vmem>>) attributes {dimension_semantics = [#tpu.dimension_semantics<parallel>, #tpu.dimension_semantics<arbitrary>], iteration_bounds = array<i64: 2, 1>, scalar_prefetch = 0 : i64, scratch_operands = 0 : i64, tpu.core_type = #tpu.core_type<tc>, window_params = [{transform_indices = @transform_0, window_bounds = array<i64: 16, 128>}, {transform_indices = @transform_1, window_bounds = array<i64: 16, 128>}, {transform_indices = @transform_2, window_bounds = array<i64: 1, 8, 128>}]} {
    %c1_i32 = arith.constant 1 : i32
    %0 = arith.muli %arg0, %c1_i32 : i32
    %1 = arith.addi %0, %arg1 : i32
    %c0_i32 = arith.constant 0 : i32
    %2 = arith.cmpi eq, %arg1, %c0_i32 : i32
    %3 = arith.extui %2 : i1 to i32
    %c0_i32_0 = arith.constant 0 : i32
    %4 = arith.cmpi ne, %3, %c0_i32_0 : i32
    scf.if %4 {
      %cst = arith.constant 0.000000e+00 : f32
      %11 = vector.broadcast %cst : f32 to vector<8x128xf32>
      %c0 = arith.constant 0 : index
      %c0_5 = arith.constant 0 : index
      %c0_6 = arith.constant 0 : index
      %12 = vector.load %arg4[%c0, %c0_5, %c0_6] : memref<1x8x128xf32, #tpu.memory_space<vmem>>, vector<1x8x128xf32>
      %13 = vector.shape_cast %12 : vector<1x8x128xf32> to vector<8x128xf32>
      %14 = vector.shape_cast %11 : vector<8x128xf32> to vector<1x8x128xf32>
      tpu.vector_store %arg4[%c0, %c0_5, %c0_6], %14 {strides = array<i32>} : memref<1x8x128xf32, #tpu.memory_space<vmem>>, vector<1x8x128xf32>,
    } else {
    }
    %c1_i32_1 = arith.constant 1 : i32
    %5 = arith.cmpi slt, %1, %c1_i32_1 : i32
    %6 = arith.extui %5 : i1 to i32
    %c0_i32_2 = arith.constant 0 : i32
    %7 = arith.cmpi ne, %6, %c0_i32_2 : i32
    scf.if %7 {
      %c0_i32_5 = arith.constant 0 : i32
      %c16_i32 = arith.constant 16 : i32
      %11 = arith.muli %c0_i32_5, %c16_i32 : i32
      %12 = tpu.assume_multiple %11, 16 : i32
      %13 = arith.index_cast %12 : i32 to index
      %c0 = arith.constant 0 : index
      %14 = vector.load %arg2[%13, %c0] : memref<16x128xf32, #tpu.memory_space<vmem>>, vector<16x128xf32>
      %15 = arith.index_cast %12 : i32 to index
      %c0_6 = arith.constant 0 : index
      %16 = vector.load %arg3[%15, %c0_6] : memref<16x128xf32, #tpu.memory_space<vmem>>, vector<16x128xf32>
      %17 = arith.subf %14, %16 : vector<16x128xf32>
      %c0_7 = arith.constant 0 : index
      %c0_8 = arith.constant 0 : index
      %c0_9 = arith.constant 0 : index
      %18 = vector.load %arg4[%c0_7, %c0_8, %c0_9] : memref<1x8x128xf32, #tpu.memory_space<vmem>>, vector<1x8x128xf32>
      %19 = vector.shape_cast %18 : vector<1x8x128xf32> to vector<8x128xf32>
      %20 = arith.mulf %17, %17 : vector<16x128xf32>
      %21 = vector.shape_cast %20 : vector<16x128xf32> to vector<2x8x128xf32>
      %cst = arith.constant dense<0.000000e+00> : vector<8x128xf32>
      %22 = vector.multi_reduction <add>, %21, %cst [0] : vector<2x8x128xf32> to vector<8x128xf32>
      %23 = arith.addf %19, %22 : vector<8x128xf32>
      %c0_10 = arith.constant 0 : index
      %c0_11 = arith.constant 0 : index
      %c0_12 = arith.constant 0 : index
      %24 = vector.load %arg4[%c0_10, %c0_11, %c0_12] : memref<1x8x128xf32, #tpu.memory_space<vmem>>, vector<1x8x128xf32>
      %25 = vector.shape_cast %24 : vector<1x8x128xf32> to vector<8x128xf32>
      %26 = vector.shape_cast %23 : vector<8x128xf32> to vector<1x8x128xf32>
      tpu.vector_store %arg4[%c0_10, %c0_11, %c0_12], %26 {strides = array<i32>} : memref<1x8x128xf32, #tpu.memory_space<vmem>>, vector<1x8x128xf32>,
      %c1_i32_13 = arith.constant 1 : i32
    } else {
    }
    %c1_i32_3 = arith.constant 1 : i32
    %8 = arith.cmpi sge, %1, %c1_i32_3 : i32
    %9 = arith.extui %8 : i1 to i32
    %c0_i32_4 = arith.constant 0 : i32
    %10 = arith.cmpi ne, %9, %c0_i32_4 : i32
    scf.if %10 {
      %c0_i32_5 = arith.constant 0 : i32
      %c16_i32 = arith.constant 16 : i32
      %11 = arith.muli %c0_i32_5, %c16_i32 : i32
      %12 = tpu.assume_multiple %11, 16 : i32
      %13 = arith.index_cast %12 : i32 to index
      %c0 = arith.constant 0 : index
      %14 = vector.load %arg2[%13, %c0] : memref<16x128xf32, #tpu.memory_space<vmem>>, vector<16x128xf32>
      %15 = arith.index_cast %12 : i32 to index
      %c0_6 = arith.constant 0 : index
      %16 = vector.load %arg3[%15, %c0_6] : memref<16x128xf32, #tpu.memory_space<vmem>>, vector<16x128xf32>
      %17 = arith.subf %14, %16 : vector<16x128xf32>
      %c16_i32_7 = arith.constant 16 : i32
      %18 = arith.muli %1, %c16_i32_7 : i32
      %19 = arith.addi %18, %12 : i32
      %20 = tpu.iota {dimensions = array<i32: 0>} : vector<16x1xi32>
      %21 = vector.broadcast %19 : i32 to vector<16x1xi32>
      %22 = arith.addi %21, %20 : vector<16x1xi32>
      %c16_i32_8 = arith.constant 16 : i32
      %23 = vector.broadcast %c16_i32_8 : i32 to vector<16x1xi32>
      %24 = arith.cmpi slt, %22, %23 : vector<16x1xi32>
      %cst = arith.constant 0.000000e+00 : f32
      %25 = vector.shape_cast %24 : vector<16x1xi1> to vector<16x1xi1>
      %26 = vector.broadcast %25 : vector<16x1xi1> to vector<16x128xi1>
      %27 = vector.broadcast %cst : f32 to vector<16x128xf32>
      %28 = arith.select %26, %17, %27 : vector<16x128xi1>, vector<16x128xf32>
      %c0_9 = arith.constant 0 : index
      %c0_10 = arith.constant 0 : index
      %c0_11 = arith.constant 0 : index
      %29 = vector.load %arg4[%c0_9, %c0_10, %c0_11] : memref<1x8x128xf32, #tpu.memory_space<vmem>>, vector<1x8x128xf32>
      %30 = vector.shape_cast %29 : vector<1x8x128xf32> to vector<8x128xf32>
      %31 = arith.mulf %28, %28 : vector<16x128xf32>
      %32 = vector.shape_cast %31 : vector<16x128xf32> to vector<2x8x128xf32>
      %cst_12 = arith.constant dense<0.000000e+00> : vector<8x128xf32>
      %33 = vector.multi_reduction <add>, %32, %cst_12 [0] : vector<2x8x128xf32> to vector<8x128xf32>
      %34 = arith.addf %30, %33 : vector<8x128xf32>
      %c0_13 = arith.constant 0 : index
      %c0_14 = arith.constant 0 : index
      %c0_15 = arith.constant 0 : index
      %35 = vector.load %arg4[%c0_13, %c0_14, %c0_15] : memref<1x8x128xf32, #tpu.memory_space<vmem>>, vector<1x8x128xf32>
      %36 = vector.shape_cast %35 : vector<1x8x128xf32> to vector<8x128xf32>
      %37 = vector.shape_cast %34 : vector<8x128xf32> to vector<1x8x128xf32>
      tpu.vector_store %arg4[%c0_13, %c0_14, %c0_15], %37 {strides = array<i32>} : memref<1x8x128xf32, #tpu.memory_space<vmem>>, vector<1x8x128xf32>,
      %c1_i32_16 = arith.constant 1 : i32
    } else {
    }
    return
  }
  func.func @transform_0(%arg0: i32, %arg1: i32) -> (i32, i32) {
    %c1_i32 = arith.constant 1 : i32
    %0 = arith.muli %arg0, %c1_i32 : i32
    %1 = arith.addi %0, %arg1 : i32
    %c0_i32 = arith.constant 0 : i32
    %2 = arith.minsi %1, %c0_i32 : i32
    %c0_i32_0 = arith.constant 0 : i32
    %c0_i32_1 = arith.constant 0 : i32
    return %2, %c0_i32_0 : i32, i32
  }
  func.func @transform_1(%arg0: i32, %arg1: i32) -> (i32, i32) {
    %c1_i32 = arith.constant 1 : i32
    %0 = arith.muli %arg0, %c1_i32 : i32
    %1 = arith.addi %0, %arg1 : i32
    %c0_i32 = arith.constant 0 : i32
    %2 = arith.minsi %1, %c0_i32 : i32
    %c0_i32_0 = arith.constant 0 : i32
    %c0_i32_1 = arith.constant 0 : i32
    return %2, %c0_i32_0 : i32, i32
  }
  func.func @transform_2(%arg0: i32, %arg1: i32) -> (i32, i32, i32) {
    %c0_i32 = arith.constant 0 : i32
    %c0_i32_0 = arith.constant 0 : i32
    %c0_i32_1 = arith.constant 0 : i32
    return %arg0, %c0_i32, %c0_i32_0 : i32, i32, i32
  }
}

</mosaic_0001>

<bundles_post_ra>
// kernel: tpu_custom_call.1
= control target key start
LH: loop header
LB: loop body
LE: loop exit
PB: predicated region body
PF: predicated region fallthrough
CT: control target
= control target key end

     0   :  { %7 = vsyncpa [#allocation3], 0  ;;  %s916_s0 = inlined_call_operand.hbm [shape: f32[16,128], index: 0, kind: input, shape index: {}]   ;;  %s917_s1 = inlined_call_operand.hbm [shape: f32[16,128], index: 1, kind: input, shape index: {}]   ;;  %s918_s2 = inlined_call_operand.hbm [shape: f32[2,8,128], index: 2, kind: output, shape index: {}]  }
   0x1   :  { %9 = vsyncpa [#allocation3 + $0x1], 0 }
   0x2   :  { %10 = vsyncpa [#allocation6], 0 }
   0x3   :  { %12 = vsyncpa [#allocation6 + $0x1], 0 }
   0x4   :  { %13 = vsyncpa [#allocation4], 0 }
   0x5   :  { %15 = vsyncpa [#allocation4 + $0x1], 0  ;;  %s721_s9 = smov 0   ;;  %s723_s10 = smov 0  }
   0x6   :  { %s725_s11 = smov 0   ;;  %s727_s12 = smov 0  }
   0x7   :  { %s729_s13 = smov 0   ;;  %s731_s14 = smov 0  }
   0x8   :  { %s733_s15 = smov 0   ;;  %s735_s16 = smov 0  }
   0x9 LB: > { %s415_s17 = sadd.s32 4294967295, %s699_s16   ;;  %s416_s18 = sadd.s32 4294967294, %s699_s16   ;;  %s699_s16 = sphi %s735_s16, %s21_s16   ;;  %s695_s15 = sphi %s733_s15, %s930_s15   ;;  %s691_s14 = sphi %s731_s14, %s929_s14   ;;  %s687_s13 = sphi %s729_s13, %s906_s13   ;;  %s683_s12 = sphi %s727_s12, %s928_s12   ;;  %s679_s11 = sphi %s725_s11, %s927_s11   ;;  %s675_s10 = sphi %s723_s10, %s926_s10   ;;  %s671_s9 = sphi %s721_s9, %s925_s9  }
   0xa   : > { %s33_s19 = sadd.s32 1, %s695_s15  ;;  %p668_p1 = scmp.ne.s32.totalorder %s687_s13, 0 }
   0xb   : > { %p35_p0 = scmp.ge.s32.totalorder %s33_s19, 2  ;;  %p54_p2 = scmp.eq.s32.totalorder %s699_s16, 0 }
   0xc   : > { %p59_p3 = scmp.ne.s32.totalorder %s687_s13, %s683_s12  ;;  %p60_p5 = scmp.eq.s32.totalorder %s415_s17, 0 }
   0xd   : > { %s932_s19 = smov (%p35_p0, %s33_s19), 0  ;;  %p767_p4 = por %p668_p1, %p54_p2 }
   0xe   : > { %p771_p6 = por %p60_p5, %p59_p3  ;;  %s101_s22 = ssub.s32 %s695_s15, %s932_s19 }
   0xf   : > { %p102_p7 = scmp.eq.s32.totalorder %s101_s22, 0  ;;  %s104_s23 = sadd.s32 1, %s679_s11 }
  0x10   : > { %p114_p8 = scmp.ne.s32.totalorder %s679_s11, %s675_s10  ;;  %p115_p9 = scmp.eq.s32.totalorder %s415_s17, 1 }
  0x11   : > { %s779_s24 = scalar_select %p102_p7, %s679_s11, %s104_s23  }
  0x12   : > { %p120_p10 = scmp.ne.s32.totalorder %s675_s10, %s671_s9  ;;  %p121_p11 = scmp.eq.s32.totalorder %s416_s18, 1 }
  0x13   : > { %p785_p12 = por %p115_p9, %p114_p8  ;;  %p418_p13 = scmp.ge.s32.totalorder %s699_s16, 2 }
  0x14   : > { %p790_p0 = por %p121_p11, %p120_p10  ;;  %p455_p1 = scmp.lt.s32.totalorder %s699_s16, 2 }
  0x15   : > { %s154_s29 = sshll.u32 %s916_s0, 4  ;;  %s701_s30 = smov [#allocation2]   ;;  %s155_s29 = int_to_ptr.hbm [resolvable:$true] %s154_s29 }
  0x16   : > { %s156_s3 = sshll.u32 %s701_s30, 4  ;;  %p800_p2 = pnand %p455_p1, %p767_p4  ;;  %s157_s3 = int_to_ptr.vmem [resolvable:$true] %s156_s3 }
  0x17   : > { %p425_p3 = scmp.ge.s32.totalorder %s699_s16, 1  ;;  %p189_p5 = scmp.lt.s32.totalorder %s699_s16, 3 }
  0x18   : > { %s532_s5 = sshra.s32 %s155_s29, 4  ;;  %p536_p8 = pneg %p800_p2  ;;  %s533_s5 = int_to_ptr.hbm [resolvable:$true] %s532_s5 }
  0x19   : > { %s534_s6 = scalar_lea.hbm %s533_s5, 16  ;;  %s539_s12 = scalar_lea.hbm %s916_s0, 16 }
  0x1a   : > { %p535_p7 = scmp.ne.s32.totalorder %s533_s5, %s534_s6  ;;  %p541_p4 = scmp.lt.s32.totalorder %s539_s12, %s534_s6 }
  0x1c   : > { %p537_p9 = pnand %p536_p8, %p535_p7 }
  0x1e   : > { %p538_p10 = pneg %p537_p9 }
  0x20   : > { %p543_p11 = pnand %p541_p4, %p538_p10 }
  0x22   : > { %546 = shalt.err (!%p543_p11)
}
  0x23   : > { %s702_s17 = smov 128   ;;  %s703_s18 = smov 8  }
  0x24   : > { %447 = dma.hbm_to_vmem [thread:$0]  (!%p800_p2), %s155_s29, 256, %s157_s3, [#allocation3], %s702_s17, %s702_s17, %s703_s18  }
  0x25   : > { %p820_p1 = pnand %p425_p3, %p189_p5  ;;  %s179_s27 = sshll.u32 %s917_s1, 4  ;;  %s180_s27 = int_to_ptr.hbm [resolvable:$true] %s179_s27 }
  0x26   : > { %s704_s28 = smov [#allocation5]   ;;  %s562_s5 = sshra.s32 %s180_s27, 4  ;;  %s563_s5 = int_to_ptr.hbm [resolvable:$true] %s562_s5 }
  0x27   : > { %s181_s30 = sshll.u32 %s704_s28, 4  ;;  %s564_s6 = scalar_lea.hbm %s563_s5, 16  ;;  %s182_s30 = int_to_ptr.vmem [resolvable:$true] %s181_s30 }
  0x28   : > { %p565_p7 = scmp.ne.s32.totalorder %s563_s5, %s564_s6  ;;  %s569_s7 = scalar_lea.hbm %s917_s1, 16 }
  0x29   : > { %p571_p3 = scmp.lt.s32.totalorder %s569_s7, %s564_s6 }
  0x2a   : > { %p567_p9 = pnand %p565_p7, %p536_p8 }
  0x2c   : > { %p568_p10 = pneg %p567_p9 }
  0x2e   : > { %p573_p5 = pnand %p571_p3, %p568_p10 }
  0x30   : > { %576 = shalt.err (!%p573_p5)
}
  0x31   : > { %450 = dma.hbm_to_vmem [thread:$0]  (!%p800_p2), %s180_s27, 256, %s182_s30, [#allocation6], %s702_s17, %s702_s17, %s703_s18  }
  0x32   : > { %193 = sbr.rel (%p820_p1) target bundleno = 115 (0x73), region = 28  ;;  %s195_s8 = sand.u32 (!%p820_p1), 1, %s687_s13  }
  0x33   : > { %s426_s12 = sshll.u32 (!%p820_p1), %s195_s8, 4  ;;  %s196_s22 = scalar_lea.sflag (!%p820_p1), [#allocation3], %s195_s8 }
  0x34   : > { %s838_s23 = scalar_lea.vmem (!%p820_p1), [#allocation2], %s426_s12 }
  0x37   : > { %657 = dma.done.wait (%p771_p6), %s196_s22, 256  }
  0x38   : > { %659 = vsyncadd (%p771_p6), %s196_s22, 4294967040  ;;  %s206_s28 = scalar_lea.sflag [#allocation6], %s195_s8  ;;  %s844_s5 = scalar_lea.vmem [#allocation5], %s426_s12 }
  0x39   : > { %661 = dma.done.wait (%p771_p6), %s206_s28, 256  }
  0x3a   : > { %663 = vsyncadd (%p771_p6), %s206_s28, 4294967040  ;;  %s233_s4 = sand.u32 1, %s675_s10   ;;  %v705_v0 = vmov 0.0   ;;  %p429_p2 = scmp.ge.s32.totalorder %s691_s14, 1 }
  0x3b   : > { %s428_s17 = sshll.u32 %s233_s4, 3 }
  0x3c   : > { %s853_s18 = scalar_lea.vmem [#allocation7], %s428_s17  ;;  %253 = sbr.rel (%p429_p2) target bundleno = 76 (0x4c), region = 44 }
  0x3d   : > { %249 = vst [vmem:[%s853_s18] sm:$0xff] %v705_v0 }
  0x41   : > { %v254_v1 = vld [vmem:[%s838_s23] sm:$0xff]  ;;  %v255_v2 = vld [vmem:[%s838_s23 + $0x8] sm:$0xff] }
  0x42   : > { %v256_v3 = vld [vmem:[%s844_s5] sm:$0xff]  ;;  %v257_v4 = vld [vmem:[%s844_s5 + $0x8] sm:$0xff] }
  0x43   : > { %v258_v5 = vsub.f32 %v254_v1, %v256_v3  ;;  %v259_v6 = vsub.f32 %v255_v2, %v257_v4 }
  0x44   : > { %v260_v9 = vld [vmem:[%s853_s18] sm:$0xff] }
  0x45   : > { %v261_v7 = vmul.f32 %v258_v5, %v258_v5  ;;  %v262_v8 = vmul.f32 %v259_v6, %v259_v6 }
  0x47   : > { %v263_v10 = vadd.f32 %v262_v8, %v261_v7 }
  0x49   : > { %v264_v11 = vadd.f32 %v263_v10, %v260_v9 }
  0x4b   : > { %265 = vst [vmem:[%s853_s18] sm:$0xff] %v264_v11 }
  0x4c PF: > { %p430_p6 = scmp.lt.s32.totalorder %s691_s14, 1 }
  0x4d   : > { %s431_s21 = sshll.u32 (!%p430_p6), %s691_s14, 4 }
  0x4e   : > { %269 = sbr.rel (%p430_p6) target bundleno = 100 (0x64), region = 48 }
  0x53   : > { %v270_v12 = vld [vmem:[%s838_s23] sm:$0xff]  ;;  %v278_v14 = vlaneseq  ;;  %v281_v15 = vstv %s431_s21  ;;  %v271_v16 = vld [vmem:[%s838_s23 + $0x8] sm:$0xff] }
  0x54   : > { %v272_v13 = vld [vmem:[%s844_s5] sm:$0xff]  ;;  %v273_v17 = vld [vmem:[%s844_s5 + $0x8] sm:$0xff] }
  0x55   : > { %v279_v18 = vshrl.u32 %v278_v14, 7  ;;  %v274_v19 = vsub.f32 %v270_v12, %v272_v13  ;;  %v275_v22 = vsub.f32 %v271_v16, %v273_v17  ;;  %v292_v28 = vld [vmem:[%s853_s18] sm:$0xff] }
  0x57   : > { %v280_v20 = vadd.s32 8, %v279_v18  ;;  %v282_v21 = vadd.s32 %v281_v15, %v279_v18 }
  0x59   : > { %v283_v23 = vadd.s32 %v281_v15, %v280_v20  ;;  %vm284_vm0 = vcmp.lt.s32.totalorder %v282_v21, 16 }
  0x5a   : > { %v290_v24 = vsel %vm284_vm0, %v274_v19, 0.0 }
  0x5b   : > { %vm285_vm1 = vcmp.lt.s32.totalorder %v283_v23, 16  ;;  %v293_v25 = vmul.f32 %v290_v24, %v290_v24 }
  0x5c   : > { %v291_v26 = vsel %vm285_vm1, %v275_v22, 0.0 }
  0x5d   : > { %v294_v27 = vmul.f32 %v291_v26, %v291_v26 }
  0x5f   : > { %v295_v29 = vadd.f32 %v294_v27, %v293_v25 }
  0x61   : > { %v296_v30 = vadd.f32 %v295_v29, %v292_v28 }
  0x63   : > { %297 = vst [vmem:[%s853_s18] sm:$0xff] %v296_v30 }
  0x64 PF: > { %s433_s20 = sshll.u32 %s691_s14, 3  ;;  %s311_s29 = sshll.u32 %s853_s18, 4  ;;  %s312_s29 = int_to_ptr.vmem [resolvable:$true] %s311_s29 }
  0x65   : > { %s309_s6 = scalar_lea.hbm %s918_s2, %s433_s20  ;;  %s299_s7 = scalar_lea.sflag [#allocation4], %s233_s4 }
  0x66   : > { %s313_s3 = sshll.u32 %s309_s6, 4  ;;  %s612_s14 = scalar_lea.hbm %s918_s2, 16  ;;  %s314_s3 = int_to_ptr.hbm [resolvable:$true] %s313_s3 }
  0x67   : > { %s606_s8 = sshra.s32 %s314_s3, 4  ;;  %s607_s8 = int_to_ptr.hbm [resolvable:$true] %s606_s8 }
  0x68   : > { %s608_s12 = scalar_lea.hbm %s607_s8, 8  ;;  %p613_p1 = scmp.lt.s32.totalorder %s607_s8, %s918_s2 }
  0x69   : > { %p609_p8 = scmp.ne.s32.totalorder %s607_s8, %s608_s12  ;;  %p614_p7 = scmp.lt.s32.totalorder %s612_s14, %s608_s12 }
  0x6b   : > { %p610_p4 = pnand %p609_p8, %p785_p12  ;;  %p615_p9 = por %p614_p7, %p613_p1 }
  0x6d   : > { %p611_p11 = pneg %p610_p4 }
  0x6f   : > { %p616_p10 = pnand %p615_p9, %p611_p11 }
  0x71   : > { %619 = shalt.err (!%p616_p10)
}
  0x72   : > { %442 = dma.vmem_to_hbm [thread:$0]  (%p785_p12), %s312_s29, 128, %s314_s3, %s299_s7  }
  0x73 PF: > { %s325_s4 = sand.u32 1, %s671_s9   ;;  %p452_p3 = pnand %p418_p13, %p790_p0 }
  0x74   : > { %s326_s17 = scalar_lea.sflag [#allocation4], %s325_s4 }
  0x75   : > { %p453_p5 = pneg %p452_p3 }
  0x77   : > { %665 = dma.done.wait (%p453_p5), %s326_s17, 128  }
  0x78   : > { %667 = vsyncadd (%p453_p5), %s326_s17, 4294967168  ;;  %s21_s16 = sadd.s32 1, %s699_s16   ;;  %s925_s9 = smov %s675_s10 }
  0x79   : > { %p18_p2 = scmp.ge.s32.totalorder %s21_s16, 4   ;;  %s926_s10 = smov %s679_s11 }
  0x7a   : > { %s927_s11 = smov %s779_s24  ;;  %s928_s12 = smov %s687_s13 }
  0x7b   : > { %s906_s13 = smov 0   ;;  %s929_s14 = smov %s695_s15 }
  0x7c   : > { %s930_s15 = smov %s932_s19  ;;  %20 = sbr.rel (!%p18_p2) target bundleno = 9 (0x9), region = 98 }
  0x81   :  { %332 = vsyncpa [#allocation3], 1 }
  0x82   :  { %334 = vsyncpa [#allocation3 + $0x1], 1 }
  0x83   :  { %335 = vsyncpa [#allocation6], 1 }
  0x84   :  { %337 = vsyncpa [#allocation6 + $0x1], 1 }
  0x85   :  { %338 = vsyncpa [#allocation4], 1 }
  0x86   :  { %340 = vsyncpa [#allocation4 + $0x1], 1 }

</bundles_post_ra>
